<compile_context>
chip_gen: v7x
topology: tpu7x:2x2x1
jax: 0.10.0
libtpu: 0.0.40
codegen_flags: <defaults>
</compile_context>

<pallas_src>
import jax
import jax.numpy as jnp
from jax import lax
from jax.experimental import pallas as pl
from jax.experimental.pallas import tpu as pltpu


def _round_up(a, b):
    return (a + b - 1) // b * b


def _egat_scatter_project_kernel(blk_ref, fst_ref, lst_ref,      # scalar prefetch (SMEM)
                                 row_ref, xg_ref, w_ref,          # inputs (VMEM)
                                 z_ref,                           # output (VMEM)
                                 acc_ref):                        # scratch (VMEM, f32)
    # Grid is 1-D over bucketed edge tiles.  blk_ref[t] is the node block this
    # tile scatters into; consecutive tiles of the same block keep the output
    # block resident (accumulator pattern).  fst/lst flag the first / last tile
    # of each block.
    t = pl.program_id(0)
    tile_n = z_ref.shape[0]
    tile_e = xg_ref.shape[0]

    @pl.when(fst_ref[t] == 1)
    def _init():
        acc_ref[...] = jnp.zeros_like(acc_ref)

    node_base = blk_ref[t] * tile_n
    # Subtract node_base from the [1, tile_e] row tile (cheap) instead of adding
    # it to the full [tile_n, tile_e] iota.  Padded / foreign rows (-1 or other
    # blocks) fall outside [0, tile_n) and never match.
    rel = row_ref[...] - node_base                                  # [1, tile_e]
    onehot = (lax.broadcasted_iota(jnp.int32, (tile_n, tile_e), 0)
              == rel).astype(xg_ref.dtype)                          # [tile_n, tile_e]
    acc_ref[...] += jnp.dot(onehot, xg_ref[...],
                            preferred_element_type=jnp.float32)     # [tile_n, Cin] f32

    @pl.when(lst_ref[t] == 1)
    def _project_and_store():
        # Per-block epilogue: project the accumulated raw features once and emit
        # a lane-dense [tile_n, 128] block (unmasked stores).
        z_ref[...] = jnp.dot(acc_ref[...], w_ref[...],
                             preferred_element_type=jnp.float32).astype(z_ref.dtype)


def init_params(key, in_channels, out_channels, number_edge_features=1):
    # Mirrors EGAT.initialize_parameters: uniform(-1/sqrt(in_channels), +...)
    # for all three weight matrices (no biases).  Returned pre-transposed.
    bound = 1.0 / (in_channels ** 0.5)
    k1, k2, k3 = jax.random.split(key, 3)
    fc_w = jax.random.uniform(k1, (out_channels, in_channels),
                              jnp.float32, -bound, bound)
    fc_edge_w = jax.random.uniform(k2, (3, number_edge_features),
                                   jnp.float32, -bound, bound)
    fc_att_w = jax.random.uniform(k3, (1, 2 * out_channels + 3),
                                  jnp.float32, -bound, bound)
    return fc_w.T, fc_edge_w.T, fc_att_w.T   # [Cin,Cout], [Fe,3], [2Cout+3,1]


def egat_forward(params, x, edge_index, edge_attr, *,
                 tile_n_max=1024, tile_e_max=4096,
                 compute_dtype=jnp.bfloat16):
    w_t, _we_t, wa_t = params
    N, Cin = x.shape
    Cout = w_t.shape[1]
    # The leaky-relu / softmax attention path is elided because softmax over the
    # size-1 attention axis (dim=1 of an [E, 1] tensor) is identically 1.0, so
    # h == x[col] @ W^T exactly.  Gate the elision explicitly: it is ONLY valid
    # for a single attention column (review correctness concern).
    assert wa_t.shape == (2 * Cout + 3, 1), \
        "softmax elision requires a single attention column"
    del edge_attr   # only feeds the elided singleton-softmax path

    row = edge_index[0].astype(jnp.int32)
    col = edge_index[1].astype(jnp.int32)
    E = int(row.shape[0])

    # ---- static tiling -------------------------------------------------------
    cout_pad = _round_up(Cout, 128)                       # lane-dense z stores
    tile_n = min(_round_up(N, 8), _round_up(tile_n_max, 8))
    n_pad = _round_up(N, tile_n)
    num_blocks = n_pad // tile_n
    tile_e = min(_round_up(E, 128), _round_up(tile_e_max, 128))
    # Static upper bound on the number of bucketed edge tiles: each block gets at
    # least one tile and ceil-rounding adds < 1 tile per block.
    num_tiles = -(-E // tile_e) + num_blocks
    L = num_tiles * tile_e

    # ---- plain-JAX glue: bucket edges by destination node block --------------
    blk_of_edge = row // tile_n                                       # [E]
    order = jnp.argsort(blk_of_edge)
    row_s, col_s, blk_s = row[order], col[order], blk_of_edge[order]

    counts = jnp.zeros((num_blocks,), jnp.int32).at[blk_of_edge].add(1)
    tiles_per_blk = jnp.maximum((counts + tile_e - 1) // tile_e, 1)   # >=1 / block
    zero1 = jnp.zeros((1,), jnp.int32)
    tile_start = jnp.concatenate([zero1, jnp.cumsum(tiles_per_blk)])  # [B+1]
    edge_start = jnp.concatenate([zero1, jnp.cumsum(counts)])         # [B+1]

    # Slot of each (sorted) edge inside the padded, tile-aligned edge layout.
    rank = jnp.arange(E, dtype=jnp.int32) - edge_start[blk_s]
    pos = tile_start[blk_s] * tile_e + rank                           # unique

    row_pad = jnp.full((L,), -1, jnp.int32).at[pos].set(row_s).reshape(1, L)
    x_gather = x.astype(compute_dtype)[col_s]                         # [E, Cin]
    xg_pad = jnp.zeros((L, Cin), compute_dtype).at[pos].set(x_gather)

    # Per-tile metadata, scalar-prefetched into SMEM.
    t_idx = jnp.arange(num_tiles, dtype=jnp.int32)
    blk_of_tile = (jnp.searchsorted(tile_start, t_idx, side="right")
                   .astype(jnp.int32) - 1)
    # Unused padding tiles alias the last real block; they only see row == -1,
    # so they accumulate zeros and never rewrite z.
    blk_of_tile = jnp.clip(blk_of_tile, 0, num_blocks - 1)
    first_flag = (t_idx == tile_start[blk_of_tile]).astype(jnp.int32)
    last_flag = (t_idx == tile_start[blk_of_tile + 1] - 1).astype(jnp.int32)

    w_mat = jnp.pad(w_t.astype(jnp.float32), ((0, 0), (0, cout_pad - Cout)))

    # ---- explicit VMEM budget (fits v7x 64 MiB; v5e/v6e have 128 MiB) ---------
    csize = jnp.dtype(compute_dtype).itemsize
    lane = lambda c: _round_up(c, 128)
    vmem_est = (tile_n * tile_e * csize                # materialized one-hot temp
                + 2 * tile_e * lane(Cin) * csize       # double-buffered x tiles
                + 2 * 8 * tile_e * 4                   # row-id tiles (sublane pad)
                + 2 * tile_n * cout_pad * 4            # double-buffered z block
                + tile_n * lane(Cin) * 4               # f32 accumulator scratch
                + 2 * Cin * cout_pad * 4)              # projection weights
    vmem_limit = int(min(64 * 1024 * 1024, max(2 * vmem_est, 16 * 1024 * 1024)))

    grid_spec = pltpu.PrefetchScalarGridSpec(
        num_scalar_prefetch=3,
        grid=(num_tiles,),
        in_specs=[
            # row ids for this edge tile
            pl.BlockSpec((1, tile_e), lambda t, blk, fst, lst: (0, t)),
            # gathered+bucketed source node features for this edge tile
            # (if the DMA is still exposed at large tile_e, add
            #  pipeline_mode=pl.Buffered(3) here — cheap on v5e/v6e, recheck v7x)
            pl.BlockSpec((tile_e, Cin), lambda t, blk, fst, lst: (t, 0)),
            # projection weights, resident (constant block index -> no re-DMA)
            pl.BlockSpec((Cin, cout_pad), lambda t, blk, fst, lst: (0, 0)),
        ],
        out_specs=pl.BlockSpec((tile_n, cout_pad),
                               lambda t, blk, fst, lst: (blk[t], 0)),
        scratch_shapes=[pltpu.VMEM((tile_n, Cin), jnp.float32)],
    )

    # TODO(synk): on v7x (2 TensorCores) add a leading 2-way "parallel" grid axis
    # over halves of the node blocks; the single "arbitrary" axis runs on one TC.
    z = pl.pallas_call(
        _egat_scatter_project_kernel,
        out_shape=jax.ShapeDtypeStruct((n_pad, cout_pad), jnp.float32),
        grid_spec=grid_spec,
        compiler_params=pltpu.CompilerParams(
            dimension_semantics=("arbitrary",),   # data-dependent output blocks
            vmem_limit_bytes=vmem_limit),
    )(blk_of_tile, first_flag, last_flag, row_pad, xg_pad, w_mat)

    return z[:N, :Cout]


def egat_reference(params, x, edge_index, edge_attr):
    # Pure-JAX reference mirroring the PyTorch forward EXACTLY (full attention
    # path, high-precision matmuls), used to validate the singleton-softmax
    # elision and the bucketed scatter.
    w_t, we_t, wa_t = params
    if edge_attr.ndim == 1:
        edge_attr = edge_attr[:, None]
    edge_attr = edge_attr.astype(jnp.float32)
    row, col = edge_index[0], edge_index[1]
    hi = lax.Precision.HIGHEST
    xcol = jnp.dot(x[col], w_t, precision=hi)
    xrow = jnp.dot(x[row], w_t, precision=hi)
    ed = jnp.dot(edge_attr, we_t, precision=hi)
    alpha = jnp.dot(jnp.concatenate([xrow, xcol, ed], axis=1), wa_t, precision=hi)
    alpha = jnp.where(alpha >= 0, alpha, 0.01 * alpha)
    alpha = jax.nn.softmax(alpha, axis=1)
    h = alpha * xcol
    z = jnp.zeros((x.shape[0], w_t.shape[1]), jnp.float32).at[row].add(h)
    return z


if __name__ == "__main__":
    key = jax.random.PRNGKey(0)
    k_x, k_ei, k_ea, k_p = jax.random.split(key, 4)

    # Small but non-trivial: with the small-tile overrides below there are
    # 3 node blocks and ~2 edge tiles per block, exercising the bucketing,
    # sentinel padding and per-block epilogue paths.
    N, Cin, Cout, E, Fe = 80, 8, 16, 1000, 1

    x = jax.random.normal(k_x, (N, Cin), jnp.float32)
    edge_index = jax.random.randint(k_ei, (2, E), 0, N, dtype=jnp.int32)
    edge_attr = jax.random.normal(k_ea, (E,), jnp.float32)   # 1-D -> unsqueezed
    params = init_params(k_p, Cin, Cout, number_edge_features=Fe)

    z_ref = jax.block_until_ready(egat_reference(params, x, edge_index, edge_attr))

    # (1) f32 scatter operands, deliberately small tiles -> multi-block path.
    #     Tolerance leaves headroom for reduced-precision f32 MXU passes.
    z_f32 = jax.block_until_ready(
        egat_forward(params, x, edge_index, edge_attr,
                     tile_n_max=32, tile_e_max=256,
                     compute_dtype=jnp.float32))
    assert z_f32.shape == (N, Cout)
    assert jnp.allclose(z_f32, z_ref, atol=2e-2, rtol=2e-2), "f32 path mismatch"

    # (2) default config: large tiles, bf16 scatter operands, f32 accumulation.
    #     bf16 rounds the gathered x rows, hence the looser tolerance.
    z_bf16 = jax.block_until_ready(egat_forward(params, x, edge_index, edge_attr))
    assert z_bf16.shape == (N, Cout)
    assert jnp.allclose(z_bf16, z_ref, atol=5e-2, rtol=5e-2), "bf16 path mismatch"

    print("KERNEL_OK")
</pallas_src>

<mosaic_0001>
module attributes {stable_mosaic.version = 11 : i64} {
  func.func @_egat_scatter_project_kernel(%arg0: i32, %arg1: memref<7xi32, #tpu.memory_space<smem>>, %arg2: memref<7xi32, #tpu.memory_space<smem>>, %arg3: memref<7xi32, #tpu.memory_space<smem>>, %arg4: memref<1x256xi32, #tpu.memory_space<vmem>>, %arg5: memref<256x8xf32, #tpu.memory_space<vmem>>, %arg6: memref<8x128xf32, #tpu.memory_space<vmem>>, %arg7: memref<32x128xf32, #tpu.memory_space<vmem>>, %arg8: memref<32x8xf32, #tpu.memory_space<vmem>>) attributes {dimension_semantics = [#tpu.dimension_semantics<arbitrary>], iteration_bounds = array<i64: 7>, scalar_prefetch = 3 : i64, scratch_operands = 1 : i64, tpu.core_type = #tpu.core_type<tc>, window_params = [{transform_indices = @transform_0, window_bounds = array<i64: 1, 256>}, {transform_indices = @transform_1, window_bounds = array<i64: 256, 8>}, {pipeline_mode = #tpu.pipeline_mode<synchronous>, transform_indices = @transform_2, window_bounds = array<i64: 8, 128>}, {transform_indices = @transform_3, window_bounds = array<i64: 32, 128>}]} {
    %0 = arith.index_cast %arg0 : i32 to index
    %1 = memref.load %arg2[%0] : memref<7xi32, #tpu.memory_space<smem>>
    %c1_i32 = arith.constant 1 : i32
    %2 = arith.cmpi eq, %1, %c1_i32 : i32
    %3 = arith.extui %2 : i1 to i32
    %c0_i32 = arith.constant 0 : i32
    %4 = arith.cmpi ne, %3, %c0_i32 : i32
    scf.if %4 {
      %cst_9 = arith.constant 0.000000e+00 : f32
      %26 = vector.broadcast %cst_9 : f32 to vector<32x8xf32>
      %c0_10 = arith.constant 0 : index
      %c0_11 = arith.constant 0 : index
      %27 = vector.load %arg8[%c0_10, %c0_11] : memref<32x8xf32, #tpu.memory_space<vmem>>, vector<32x8xf32>
      tpu.vector_store %arg8[%c0_10, %c0_11], %26 {strides = array<i32>} : memref<32x8xf32, #tpu.memory_space<vmem>>, vector<32x8xf32>,
    } else {
    }
    %5 = arith.index_cast %arg0 : i32 to index
    %6 = memref.load %arg1[%5] : memref<7xi32, #tpu.memory_space<smem>>
    %c32_i32 = arith.constant 32 : i32
    %7 = arith.muli %6, %c32_i32 : i32
    %c0 = arith.constant 0 : index
    %c0_0 = arith.constant 0 : index
    %8 = vector.load %arg4[%c0, %c0_0] : memref<1x256xi32, #tpu.memory_space<vmem>>, vector<1x256xi32>
    %9 = vector.broadcast %7 : i32 to vector<1x256xi32>
    %10 = arith.subi %8, %9 : vector<1x256xi32>
    %11 = tpu.iota {dimensions = array<i32: 0>} : vector<32x256xi32>
    %12 = vector.broadcast %10 : vector<1x256xi32> to vector<32x256xi32>
    %13 = arith.cmpi eq, %11, %12 : vector<32x256xi32>
    %14 = arith.extui %13 : vector<32x256xi1> to vector<32x256xi32>
    %15 = arith.sitofp %14 : vector<32x256xi32> to vector<32x256xf32>
    %c0_1 = arith.constant 0 : index
    %c0_2 = arith.constant 0 : index
    %16 = vector.load %arg8[%c0_1, %c0_2] : memref<32x8xf32, #tpu.memory_space<vmem>>, vector<32x8xf32>
    %c0_3 = arith.constant 0 : index
    %c0_4 = arith.constant 0 : index
    %17 = vector.load %arg5[%c0_3, %c0_4] : memref<256x8xf32, #tpu.memory_space<vmem>>, vector<256x8xf32>
    %cst = arith.constant dense<0.000000e+00> : vector<32x8xf32>
    %18 = tpu.matmul %15, %17, %cst {dimension_numbers = #tpu.dot_dimension_numbers<[1], [0], [0], [1], [0, 0, 1, 1], [], []>} : vector<32x256xf32>, vector<256x8xf32>, vector<32x8xf32> -> vector<32x8xf32>
    %19 = arith.addf %16, %18 : vector<32x8xf32>
    %c0_5 = arith.constant 0 : index
    %c0_6 = arith.constant 0 : index
    %20 = vector.load %arg8[%c0_5, %c0_6] : memref<32x8xf32, #tpu.memory_space<vmem>>, vector<32x8xf32>
    tpu.vector_store %arg8[%c0_5, %c0_6], %19 {strides = array<i32>} : memref<32x8xf32, #tpu.memory_space<vmem>>, vector<32x8xf32>,
    %21 = arith.index_cast %arg0 : i32 to index
    %22 = memref.load %arg3[%21] : memref<7xi32, #tpu.memory_space<smem>>
    %c1_i32_7 = arith.constant 1 : i32
    %23 = arith.cmpi eq, %22, %c1_i32_7 : i32
    %24 = arith.extui %23 : i1 to i32
    %c0_i32_8 = arith.constant 0 : i32
    %25 = arith.cmpi ne, %24, %c0_i32_8 : i32
    scf.if %25 {
      %c0_9 = arith.constant 0 : index
      %c0_10 = arith.constant 0 : index
      %26 = vector.load %arg8[%c0_9, %c0_10] : memref<32x8xf32, #tpu.memory_space<vmem>>, vector<32x8xf32>
      %c0_11 = arith.constant 0 : index
      %c0_12 = arith.constant 0 : index
      %27 = vector.load %arg6[%c0_11, %c0_12] : memref<8x128xf32, #tpu.memory_space<vmem>>, vector<8x128xf32>
      %cst_13 = arith.constant dense<0.000000e+00> : vector<32x128xf32>
      %28 = tpu.matmul %26, %27, %cst_13 {dimension_numbers = #tpu.dot_dimension_numbers<[1], [0], [0], [1], [0, 0, 1, 1], [], []>} : vector<32x8xf32>, vector<8x128xf32>, vector<32x128xf32> -> vector<32x128xf32>
      %c0_14 = arith.constant 0 : index
      %c0_15 = arith.constant 0 : index
      %29 = vector.load %arg7[%c0_14, %c0_15] : memref<32x128xf32, #tpu.memory_space<vmem>>, vector<32x128xf32>
      tpu.vector_store %arg7[%c0_14, %c0_15], %28 {strides = array<i32>} : memref<32x128xf32, #tpu.memory_space<vmem>>, vector<32x128xf32>,
    } else {
    }
    return
  }
  func.func @transform_0(%arg0: i32, %arg1: memref<7xi32, #tpu.memory_space<smem>>, %arg2: memref<7xi32, #tpu.memory_space<smem>>, %arg3: memref<7xi32, #tpu.memory_space<smem>>) -> (i32, i32) {
    %c0_i32 = arith.constant 0 : i32
    %c0_i32_0 = arith.constant 0 : i32
    return %c0_i32, %arg0 : i32, i32
  }
  func.func @transform_1(%arg0: i32, %arg1: memref<7xi32, #tpu.memory_space<smem>>, %arg2: memref<7xi32, #tpu.memory_space<smem>>, %arg3: memref<7xi32, #tpu.memory_space<smem>>) -> (i32, i32) {
    %c0_i32 = arith.constant 0 : i32
    %c0_i32_0 = arith.constant 0 : i32
    return %arg0, %c0_i32 : i32, i32
  }
  func.func @transform_2(%arg0: i32, %arg1: memref<7xi32, #tpu.memory_space<smem>>, %arg2: memref<7xi32, #tpu.memory_space<smem>>, %arg3: memref<7xi32, #tpu.memory_space<smem>>) -> (i32, i32) {
    %c0_i32 = arith.constant 0 : i32
    %c0_i32_0 = arith.constant 0 : i32
    %c0_i32_1 = arith.constant 0 : i32
    return %c0_i32, %c0_i32_0 : i32, i32
  }
  func.func @transform_3(%arg0: i32, %arg1: memref<7xi32, #tpu.memory_space<smem>>, %arg2: memref<7xi32, #tpu.memory_space<smem>>, %arg3: memref<7xi32, #tpu.memory_space<smem>>) -> (i32, i32) {
    %0 = arith.index_cast %arg0 : i32 to index
    %1 = memref.load %arg1[%0] : memref<7xi32, #tpu.memory_space<smem>>
    %c0_i32 = arith.constant 0 : i32
    %c0_i32_0 = arith.constant 0 : i32
    return %1, %c0_i32 : i32, i32
  }
}

</mosaic_0001>

<bundles_post_ra>
// kernel: tpu_custom_call.1
= control target key start
LH: loop header
LB: loop body
LE: loop exit
PB: predicated region body
PF: predicated region fallthrough
CT: control target
= control target key end

     0   :  { %s1125_s0 = inlined_call_operand.vmem [shape: s32[7], index: 0, kind: input, shape index: {}]   ;;  %s1126_s3 = inlined_call_operand.vmem [shape: s32[1,1792], index: 3, kind: input, shape index: {}]   ;;  %s1127_s4 = inlined_call_operand.vmem [shape: f32[1792,8], index: 4, kind: input, shape index: {}]   ;;  %s1128_s5 = inlined_call_operand.vmem [shape: f32[8,128], index: 5, kind: input, shape index: {}]   ;;  %s1129_s6 = inlined_call_operand.hbm [shape: f32[96,128], index: 6, kind: output, shape index: {}]   ;;  %s1130_s1 = inlined_call_operand.vmem [shape: s32[7], index: 1, kind: input, shape index: {}]   ;;  %s1131_s2 = inlined_call_operand.vmem [shape: s32[7], index: 2, kind: input, shape index: {}]  }
   0x1   :  { %s11_s23 = sshll.u32 %s1125_s0, 4  ;;  %s15_s26 = sshll.u32 %s1130_s1, 4  ;;  %s12_s23 = int_to_ptr.vmem [resolvable:$true] %s11_s23  ;;  %s16_s26 = int_to_ptr.vmem [resolvable:$true] %s15_s26 }
   0x2   :  { %s782_s27 = scalar_lea.vmem %s12_s23, 16  ;;  %p787_p1 = scmp.lt.s32.totalorder %s12_s23, %s12_s23 }
   0x3   :  { %p783_p0 = scmp.ne.s32.totalorder %s12_s23, %s782_s27  ;;  %p788_p2 = scmp.lt.s32.totalorder %s782_s27, %s782_s27 }
   0x5   :  { %p789_p3 = por %p788_p2, %p787_p1 }
   0x7   :  { %p790_p4 = pnand %p789_p3, %p783_p0 }
   0x9   :  { %793 = shalt.err (!%p790_p4)  }
   0xa   :  { %s884_s28 = smov [#allocation4]   ;;  %s794_s29 = scalar_lea.vmem %s16_s26, 16 }
   0xb   :  { %14 = dma.vmem_to_smem %s12_s23, 16, %s884_s28, [#allocation3] }
   0xc   :  { %p795_p5 = scmp.ne.s32.totalorder %s16_s26, %s794_s29  ;;  %p799_p6 = scmp.lt.s32.totalorder %s16_s26, %s16_s26 }
   0xd   :  { %p800_p7 = scmp.lt.s32.totalorder %s794_s29, %s794_s29 }
   0xf   :  { %p801_p8 = por %p800_p7, %p799_p6 }
  0x11   :  { %p802_p9 = pnand %p801_p8, %p795_p5 }
  0x13   :  { %805 = shalt.err (!%p802_p9)  }
  0x14   :  { %s885_s0 = smov [#allocation5]   ;;  %s19_s7 = sshll.u32 %s1131_s2, 4  ;;  %s20_s7 = int_to_ptr.vmem [resolvable:$true] %s19_s7 }
  0x15   :  { %18 = dma.vmem_to_smem %s16_s26, 16, %s885_s0, [#allocation3] }
  0x16   :  { %s806_s8 = scalar_lea.vmem %s20_s7, 16  ;;  %p811_p11 = scmp.lt.s32.totalorder %s20_s7, %s20_s7 }
  0x17   :  { %p807_p10 = scmp.ne.s32.totalorder %s20_s7, %s806_s8  ;;  %p812_p12 = scmp.lt.s32.totalorder %s806_s8, %s806_s8 }
  0x19   :  { %p813_p13 = por %p812_p12, %p811_p11 }
  0x1b   :  { %p814_p0 = pnand %p813_p13, %p807_p10 }
  0x1d   :  { %817 = shalt.err (!%p814_p0)  }
  0x1e   :  { %s886_s9 = smov [#allocation6]  }
  0x1f   :  { %22 = dma.vmem_to_smem %s20_s7, 16, %s886_s9, [#allocation3] }
  0x20   :  { %862 = dma.done.wait [#allocation3], 48 }
  0x21   :  { %863 = vsyncadd [#allocation3], 4294967248 }
  0x22   :  { %24 = sfence }
  0x23   :  { %25 = vsyncpa [#allocation8], 0 }
  0x24   :  { %27 = vsyncpa [#allocation8 + $0x1], 0  ;;  %s936_s10 = smov 0   ;;  %s938_s11 = smov 0  }
  0x25   :  { %s940_s2 = smov 0   ;;  %s942_s12 = smov 0  }
  0x26 LB: > { %s957_s13 = sadd.s32 4294967295, %s882_s12   ;;  %s590_s14 = sadd.s32 4294967294, %s882_s12   ;;  %s882_s12 = sphi %s942_s12, %s1137_s12   ;;  %s878_s2 = sphi %s940_s2, %s1136_s2   ;;  %s874_s11 = sphi %s938_s11, %s1135_s11   ;;  %s870_s10 = sphi %s936_s10, %s1134_s10  }
  0x27   : > { %s961_s15 = sadd.s32 1, %s882_s12   ;;  %s110_s16 = sld [smem:[#allocation4 + %s882_s12]] }
  0x28   : > { %s111_s17 = sld [smem:[#allocation4 + %s961_s15]]  ;;  %p125_p1 = scmp.ne.s32.totalorder %s878_s2, %s874_s11 }
  0x29   : > { %p126_p2 = scmp.eq.s32.totalorder %s957_s13, 6  ;;  %p131_p3 = scmp.ne.s32.totalorder %s874_s11, %s870_s10 }
  0x2a   : > { %p132_p4 = scmp.eq.s32.totalorder %s590_s14, 6  ;;  %p593_p6 = scmp.ge.s32.totalorder %s882_s12, 1 }
  0x2b   : > { %p970_p5 = por %p126_p2, %p125_p1  ;;  %p170_p8 = scmp.lt.s32.totalorder %s882_s12, 8 }
  0x2c   : > { %p975_p7 = por %p132_p4, %p131_p3  ;;  %s115_s20 = sadd.s32 1, %s878_s2 }
  0x2d   : > { %p171_p9 = pnand %p593_p6, %p170_p8 }
  0x2e   : > { %s112_s21 = ssub.s32 %s110_s16, %s111_s17  ;;  %s195_s23 = sand.u32 (!%p171_p9), 1, %s874_s11  }
  0x2f   : > { %p113_p10 = scmp.eq.s32.totalorder %s112_s21, 0  ;;  %174 = sbr.rel (%p171_p9) target bundleno = 571 (0x23b), region = 32 }
  0x30   : > { %s595_s24 = sshll.u32 (!%p171_p9), %s957_s13, 1  ;;  %s594_s25 = sshll.u32 (!%p171_p9), %s195_s23, 5 }
  0x31   : > { %s982_s22 = scalar_select %p113_p10, %s878_s2, %s115_s20  }
  0x32   : > { %p199_p11 = scmp.lt.s32.totalorder (!%p171_p9), %s595_s24, 13  ;;  %s596_s26 = sshll.u32 (!%p171_p9), %s957_s13, 5 }
  0x33   : > { %p204_p12 = scmp.lt.s32.totalorder (!%p171_p9), %s596_s26, 223  ;;  %s211_s27 = sld [smem:[#allocation5 + %s957_s13]] (!%p171_p9) }
  0x34   : > { %s1001_s9 = scalar_lea.vmem (!%p171_p9), [#allocation7], %s594_s25 }
  0x36   : > { %s1139_s24 = smov (!%p199_p11, %s595_s24), 13  ;;  %s1141_s26 = smov (!%p204_p12, %s596_s26), 223 }
  0x37   : > { %s201_s0 = scalar_lea.vmem %s1126_s3, %s1139_s24  ;;  %s597_s1 = sshll.u32 %s1141_s26, 3 }
  0x38   : > { %s999_s8 = scalar_lea.vmem %s1127_s4, %s597_s1 }
  0x39   : > { %p598_p13 = scmp.ne.s32.totalorder %s211_s27, 1 }
  0x3a   : > { %vm216_vm0 = vcmask (!%p598_p13), 64512   ;;  %v887_v0 = vmov (!%p598_p13), 0.0  }
  0x3b   : > { %215 = sbr.rel (%p598_p13) target bundleno = 66 (0x42), region = 36  ;;  %217 = vst.msk [vmem:[#allocation2] sm:$0xff] (!%p598_p13), %vm216_vm0, %v887_v0  ;;  %218 = vst.msk [vmem:[#allocation2 + $0x8] sm:$0xff] (!%p598_p13), %vm216_vm0, %v887_v0 }
  0x3c   : > { %219 = vst.msk [vmem:[#allocation2 + $0x10] sm:$0xff] (!%p598_p13), %vm216_vm0, %v887_v0  ;;  %220 = vst.msk [vmem:[#allocation2 + $0x18] sm:$0xff] (!%p598_p13), %vm216_vm0, %v887_v0 }
  0x42 PF: > { %v283_v1 = vld [vmem:[%s999_s8 + $0x80] sm:$0xff]  ;;  %v284_v2 = vld [vmem:[%s999_s8 + $0x88] sm:$0xff]  ;;  %s1007_s14 = sld [smem:[#allocation4 + %s957_s13]]  ;;  %v285_v6 = vld [vmem:[%s999_s8 + $0x90] sm:$0xff]  ;;  %v226_v8 = vlaneseq  ;;  %v888_v46 = vmov 1.0   ;;  %vm388_vm9 = vcmask 64512  }
  0x43   : > { %v267_v3 = vld [vmem:[%s999_s8] sm:$0xff]  ;;  %v684_v4 = vpack.c.bf16 %v284_v2, %v283_v1  ;;  %v268_v5 = vld [vmem:[%s999_s8 + $0x8] sm:$0xff]  ;;  %v286_v7 = vld [vmem:[%s999_s8 + $0x98] sm:$0xff]  ;;  %s393_s21 = sld [smem:[#allocation6 + %s957_s13]] }
  0x44   : > { %v686_v9 = vpack.c.bf16 %v268_v5, %v267_v3  ;;  %v688_v10 = vpack.c.bf16 %v286_v7, %v285_v6  ;;  %v269_v11 = vld [vmem:[%s999_s8 + $0x10] sm:$0xff]  ;;  %v270_v12 = vld [vmem:[%s999_s8 + $0x18] sm:$0xff]  ;;  %v287_v13 = vld [vmem:[%s999_s8 + $0xa0] sm:$0xff]  ;;  %v1018_v19 = vshrl.u32 %v226_v8, 7 }
  0x45   : > { %685 = vmatprep.subr.bf16.mxu0 %v684_v4  ;;  %716 = vmatprep.subr.bf16.mxu1 %v684_v4  ;;  %v288_v14 = vld [vmem:[%s999_s8 + $0xa8] sm:$0xff]  ;;  %v690_v15 = vpack.c.bf16 %v270_v12, %v269_v11  ;;  %v271_v17 = vld [vmem:[%s999_s8 + $0x20] sm:$0xff]  ;;  %v289_v20 = vld [vmem:[%s999_s8 + $0xb0] sm:$0xff] }
  0x46   : > { %687 = vmatpush3.bf16.msra.mxu0 %v686_v9  ;;  %724 = vmatpush3.bf16.msra.mxu1 %v686_v9  ;;  %v692_v16 = vpack.c.bf16 %v288_v14, %v287_v13  ;;  %v272_v18 = vld [vmem:[%s999_s8 + $0x28] sm:$0xff]  ;;  %v290_v21 = vld [vmem:[%s999_s8 + $0xb8] sm:$0xff]  ;;  %v273_v25 = vld [vmem:[%s999_s8 + $0x30] sm:$0xff]  ;;  %v237_v27 = vsub.s32 1, %v1018_v19  ;;  %v229_v32 = vadd.s32 16, %v1018_v19  ;;  %v233_v54 = vsub.s32 0, %v1018_v19 }
  0x47   : > { %689 = vmatprep.subr.bf16.mxu0 %v688_v10  ;;  %717 = vmatprep.subr.bf16.mxu1 %v688_v10  ;;  %v694_v22 = vpack.c.bf16 %v272_v18, %v271_v17  ;;  %v696_v24 = vpack.c.bf16 %v290_v21, %v289_v20  ;;  %v274_v26 = vld [vmem:[%s999_s8 + $0x38] sm:$0xff]  ;;  %v291_v28 = vld [vmem:[%s999_s8 + $0xc0] sm:$0xff]  ;;  %v292_v29 = vld [vmem:[%s999_s8 + $0xc8] sm:$0xff]  ;;  %v228_v60 = vadd.s32 8, %v1018_v19  ;;  %v230_v61 = vadd.s32 24, %v1018_v19 }
  0x48   : > { %s599_s16 = sshll.u32 %s1007_s14, 5  ;;  %v223_v30 = vld [vmem:[%s201_s0] sm:$0x3]  ;;  %v698_v33 = vpack.c.bf16 %v274_v26, %v273_v25  ;;  %v700_v34 = vpack.c.bf16 %v292_v29, %v291_v28  ;;  %v276_v36 = vld [vmem:[%s999_s8 + $0x48] sm:$0xff]  ;;  %v293_v38 = vld [vmem:[%s999_s8 + $0xd0] sm:$0xff] }
  0x49   : > { %v224_v23 = vstv %s599_s16  ;;  %v275_v35 = vld [vmem:[%s999_s8 + $0x40] sm:$0xff]  ;;  %v294_v39 = vld [vmem:[%s999_s8 + $0xd8] sm:$0xff]  ;;  %v277_v42 = vld [vmem:[%s999_s8 + $0x50] sm:$0xff]  ;;  %p616_p0 = scmp.ne.s32.totalorder %s393_s21, 1 }
  0x4a   : > { %691 = vmatpush3.bf16.msra.mxu0 %v690_v15  ;;  %725 = vmatpush3.bf16.msra.mxu1 %v690_v15  ;;  %v225_v31 = vsub.s32 %v223_v30, %v224_v23  ;;  %v702_v40 = vpack.c.bf16 %v276_v36, %v275_v35  ;;  %v704_v41 = vpack.c.bf16 %v294_v39, %v293_v38  ;;  %v278_v43 = vld [vmem:[%s999_s8 + $0x58] sm:$0xff]  ;;  %v295_v44 = vld [vmem:[%s999_s8 + $0xe0] sm:$0xff]  ;;  %v296_v45 = vld [vmem:[%s999_s8 + $0xe8] sm:$0xff] }
  0x4b   : > { %693 = vmatprep.subr.bf16.mxu0 %v692_v16  ;;  %718 = vmatprep.subr.bf16.mxu1 %v692_v16  ;;  %v706_v47 = vpack.c.bf16 %v278_v43, %v277_v42  ;;  %v708_v48 = vpack.c.bf16 %v296_v45, %v295_v44  ;;  %v279_v49 = vld [vmem:[%s999_s8 + $0x60] sm:$0xff]  ;;  %v280_v50 = vld [vmem:[%s999_s8 + $0x68] sm:$0xff]  ;;  %v297_v51 = vld [vmem:[%s999_s8 + $0xf0] sm:$0xff] }
  0x4c   : > { %v238_v37 = vrot.slane %v225_v31, %v237_v27  ;;  %v298_v52 = vld [vmem:[%s999_s8 + $0xf8] sm:$0xff]  ;;  %v710_v53 = vpack.c.bf16 %v280_v50, %v279_v49  ;;  %v281_v56 = vld [vmem:[%s999_s8 + $0x70] sm:$0xff]  ;;  %v234_v59 = vrot.slane %v225_v31, %v233_v54  ;;  %v263_v0 = vld [vmem:[#allocation2] sm:$0xff] }
  0x4d   : > { %v712_v55 = vpack.c.bf16 %v298_v52, %v297_v51  ;;  %v282_v57 = vld [vmem:[%s999_s8 + $0x78] sm:$0xff]  ;;  %v265_v2 = vld [vmem:[#allocation2 + $0x10] sm:$0xff]  ;;  %v264_v10 = vld [vmem:[#allocation2 + $0x8] sm:$0xff] }
  0x4e   : > { %695 = vmatpush3.bf16.msra.mxu0 %v694_v22  ;;  %726 = vmatpush3.bf16.msra.mxu1 %v694_v22  ;;  %vm240_vm1 = vcmp.eq.s32.totalorder %v1018_v19, %v238_v37  ;;  %vm244_vm2 = vcmp.eq.s32.totalorder %v229_v32, %v238_v37  ;;  %v714_v58 = vpack.c.bf16 %v282_v57, %v281_v56  ;;  %v266_v12 = vld [vmem:[#allocation2 + $0x18] sm:$0xff]  ;;  %v402_v18 = vld [vmem:[%s1128_s5] sm:$0xff] (!%p616_p0) }
  0x4f   : > { %697 = vmatprep.subr.bf16.mxu0 %v696_v24  ;;  %719 = vmatprep.subr.bf16.mxu1 %v696_v24  ;;  %vm239_vm3 = vcmp.eq.s32.totalorder %v1018_v19, %v234_v59  ;;  %vm243_vm4 = vcmp.eq.s32.totalorder %v229_v32, %v234_v59  ;;  %vm242_vm5 = vcmp.eq.s32.totalorder %v228_v60, %v238_v37 }
  0x50   : > { %608 = vmatprep.mubr.msk.f32.mxu0 %vm240_vm1, %v888_v46  ;;  %612 = vmatprep.mubr.msk.f32.mxu1 %vm244_vm2, %v888_v46  ;;  %vm246_vm6 = vcmp.eq.s32.totalorder %v230_v61, %v238_v37  ;;  %vm241_vm7 = vcmp.eq.s32.totalorder %v228_v60, %v234_v59  ;;  %vm245_vm8 = vcmp.eq.s32.totalorder %v230_v61, %v234_v59 }
  0x52   : > { %699 = vmatpush3.bf16.msra.mxu0 %v698_v33  ;;  %727 = vmatpush3.bf16.msra.mxu1 %v698_v33 }
  0x53   : > { %701 = vmatprep.subr.bf16.mxu0 %v700_v34  ;;  %720 = vmatprep.subr.bf16.mxu1 %v700_v34 }
  0x56   : > { %703 = vmatpush3.bf16.msra.mxu0 %v702_v40  ;;  %728 = vmatpush3.bf16.msra.mxu1 %v702_v40 }
  0x57   : > { %705 = vmatprep.subr.bf16.mxu0 %v704_v41  ;;  %721 = vmatprep.subr.bf16.mxu1 %v704_v41 }
  0x5a   : > { %707 = vmatpush3.bf16.msra.mxu0 %v706_v47  ;;  %729 = vmatpush3.bf16.msra.mxu1 %v706_v47 }
  0x5b   : > { %709 = vmatprep.subr.bf16.mxu0 %v708_v48  ;;  %722 = vmatprep.subr.bf16.mxu1 %v708_v48 }
  0x5e   : > { %711 = vmatpush3.bf16.msra.mxu0 %v710_v53  ;;  %730 = vmatpush3.bf16.msra.mxu1 %v710_v53 }
  0x5f   : > { %713 = vmatprep.subr.bf16.mxu0 %v712_v55  ;;  %723 = vmatprep.subr.bf16.mxu1 %v712_v55 }
  0x62   : > { %715 = vmatpush3.bf16.msra.mxu0 %v714_v58  ;;  %731 = vmatpush3.bf16.msra.mxu1 %v714_v58 }
  0x63   : > { %676 = vmatprep.subr.mxu0 (!%p616_p0), %v402_v18  ;;  %732 = vmatprep.subr.mxu1 (!%p616_p0), %v402_v18 }
  0x65   : > { %609 = vmatmul.mubr.msk.f32.vlgmr.msra.gmra.mrb[0].mxu0 %vm239_vm3, %v888_v46  ;;  %613 = vmatmul.mubr.msk.f32.vlgmr.msra.gmra.mrb[0].mxu1 %vm243_vm4, %v888_v46 }
  0x66   : > { %610 = vmatprep.mubr.msk.f32.mxu0 %vm242_vm5, %v888_v46  ;;  %614 = vmatprep.mubr.msk.f32.mxu1 %vm246_vm6, %v888_v46 }
  0x67   : > { %677 = vmatpush3.msra.mxu0 (!%p616_p0), %v402_v18  ;;  %733 = vmatpush3.msra.mxu1 (!%p616_p0), %v402_v18 }
  0x69   : > { %611 = vmatmul.mubr.msk.f32.gmra.mrb[2].mxu0 %vm241_vm7, %v888_v46  ;;  %615 = vmatmul.mubr.msk.f32.gmra.mrb[2].mxu1 %vm245_vm8, %v888_v46 }
 0x138   : > { %v659_v62 = vpop.f32.mrb[0].mxu0  ;;  %v665_v63 = vpop.f32.mrb[0].mxu1 }
 0x139   : > { %v660_v1 = vpop.f32.mrb[1].mxu0  ;;  %v666_v3 = vpop.f32.mrb[1].mxu1 }
 0x13a   : > { %v661_v4 = vadd.f32 %v660_v1, %v659_v62  ;;  %v667_v5 = vadd.f32 %v666_v3, %v665_v63 }
 0x13c   : > { %v384_v6 = vadd.f32 %v661_v4, %v263_v0  ;;  %v386_v7 = vadd.f32 %v667_v5, %v265_v2  ;;  %v662_v8 = vpop.f32.mrb[2].mxu0  ;;  %v668_v9 = vpop.f32.mrb[2].mxu1  ;;  %397 = sbr.rel (%p616_p0) target bundleno = 544 (0x220), region = 40 }
 0x13d   : > { %v663_v11 = vpop.f32.mrb[3].mxu0  ;;  %v669_v13 = vpop.f32.mrb[3].mxu1 }
 0x13e   : > { %389 = vst.msk [vmem:[#allocation2] sm:$0xff] %vm388_vm9, %v384_v6  ;;  %391 = vst.msk [vmem:[#allocation2 + $0x10] sm:$0xff] %vm388_vm9, %v386_v7  ;;  %v664_v14 = vadd.f32 %v663_v11, %v662_v8  ;;  %v670_v15 = vadd.f32 %v669_v13, %v668_v9 }
 0x140   : > { %v385_v16 = vadd.f32 %v664_v14, %v264_v10  ;;  %v387_v17 = vadd.f32 %v670_v15, %v266_v12 }
 0x142   : > { %390 = vst.msk [vmem:[#allocation2 + $0x8] sm:$0xff] %vm388_vm9, %v385_v16  ;;  %392 = vst.msk [vmem:[#allocation2 + $0x18] sm:$0xff] %vm388_vm9, %v387_v17 }
 0x145   : > { %v398_v19 = vld [vmem:[#allocation2] sm:$0xff]  ;;  %v400_v20 = vld [vmem:[#allocation2 + $0x10] sm:$0xff] }
 0x146   : > { %678 = vmatprep.mubr.msk.f32.mxu0 %vm388_vm9, %v398_v19  ;;  %681 = vmatprep.mubr.msk.f32.mxu1 %vm388_vm9, %v400_v20 }
 0x149   : > { %v399_v21 = vld [vmem:[#allocation2 + $0x8] sm:$0xff]  ;;  %v401_v22 = vld [vmem:[#allocation2 + $0x18] sm:$0xff] }
 0x14a   : > { %679 = vmatmul.mubr.msk.f32.vlgmr.msra.gmra.mrb[0].mxu0 %vm388_vm9, %v399_v21  ;;  %682 = vmatmul.mubr.msk.f32.vlgmr.msra.gmra.mrb[0].mxu1 %vm388_vm9, %v401_v22 }
 0x21d   : > { %v680_v23 = vpop.f32.mrb[0].mxu0  ;;  %v683_v24 = vpop.f32.mrb[0].mxu1 }
 0x21e   : > { %501 = vst [vmem:[%s1001_s9 + $0x8] sm:$0xff] %v680_v23  ;;  %503 = vst [vmem:[%s1001_s9 + $0x18] sm:$0xff] %v683_v24  ;;  %v481_v25 = vpop.f32.mrb[1].mxu0  ;;  %v491_v26 = vpop.f32.mrb[1].mxu1 }
 0x21f   : > { %500 = vst [vmem:[%s1001_s9] sm:$0xff] %v481_v25  ;;  %502 = vst [vmem:[%s1001_s9 + $0x10] sm:$0xff] %v491_v26 }
 0x220 PF: > { %s734_s26 = scalar_select %p970_p5, [#allocation4], [#allocation9] }
 0x221   : > { %s1143_s13 = smov (!%p970_p5, %s957_s13), 0  ;;  %s519_s28 = sshll.u32 %s1001_s9, 4  ;;  %s1075_s28 = int_to_ptr.vmem [resolvable:$true] %s519_s28 }
 0x222   : > { %s512_s27 = sld [smem:[%s734_s26 + %s1143_s13]]  ;;  %s1084_s7 = scalar_lea.sflag [#allocation8], %s195_s23 }
 0x223   : > { %s818_s8 = scalar_lea.vmem %s1075_s28, 512  ;;  %s889_s13 = smov [#allocation7]  }
 0x224   : > { %p819_p1 = scmp.ne.s32.totalorder %s1075_s28, %s818_s8  ;;  %s822_s9 = sshll.u32 %s889_s13, 4  ;;  %s823_s9 = int_to_ptr.vmem [resolvable:$false] %s822_s9 }
 0x225   : > { %s824_s14 = scalar_lea.vmem %s823_s9, 1024  ;;  %p825_p4 = scmp.lt.s32.totalorder %s1075_s28, %s823_s9 }
 0x226   : > { %p820_p2 = pnand %p819_p1, %p970_p5  ;;  %p826_p6 = scmp.lt.s32.totalorder %s824_s14, %s818_s8 }
 0x228   : > { %s626_s29 = sshll.u32 %s512_s27, 9  ;;  %p821_p3 = pneg %p820_p2 }
 0x229   : > { %s1080_s30 = scalar_lea.hbm %s1129_s6, %s626_s29  ;;  %p827_p8 = por %p826_p6, %p825_p4 }
 0x22b   : > { %p828_p9 = pnand %p827_p8, %p821_p3 }
 0x22d   : > { %831 = shalt.err (!%p828_p9)
}
 0x22e   : > { %s832_s23 = scalar_lea.hbm %s1080_s30, 512  ;;  %s836_s20 = scalar_lea.hbm %s1129_s6, 1536 }
 0x22f   : > { %p833_p10 = scmp.ne.s32.totalorder %s1080_s30, %s832_s23  ;;  %p837_p13 = scmp.lt.u32.totalorder %s1080_s30, %s1129_s6 }
 0x230   : > { %p838_p0 = scmp.lt.u32.totalorder %s836_s20, %s832_s23  ;;  %p840_p2 = scmp.lt.u32.totalorder %s832_s23, %s1080_s30 }
 0x231   : > { %p834_p11 = pnand %p833_p10, %p970_p5 }
 0x232   : > { %p839_p1 = por %p838_p0, %p837_p13 }
 0x233   : > { %p835_p12 = pneg %p834_p11 }
 0x234   : > { %p841_p3 = por %p840_p2, %p839_p1 }
 0x236   : > { %p842_p4 = pnand %p841_p3, %p835_p12 }
 0x238   : > { %845 = shalt.err (!%p842_p4)
}
 0x239   : > { %s890_s25 = smov 128   ;;  %s891_s26 = smov 8  }
 0x23a   : > { %736 = dma.vmem_to_hbm [thread:$0]  (%p970_p5), %s1075_s28, 512, %s1080_s30, %s1084_s7, %s890_s25, %s890_s25, %s891_s26  }
 0x23b PF: > { %p742_p6 = scmp.ge.s32.totalorder %s882_s12, 2  ;;  %s534_s27 = sand.u32 1, %s870_s10  }
 0x23c   : > { %s535_s29 = scalar_lea.sflag [#allocation8], %s534_s27 }
 0x23d   : > { %p739_p8 = pnand %p742_p6, %p975_p7 }
 0x23f   : > { %865 = dma.done.wait (!%p739_p8), %s535_s29, 512  }
 0x240   : > { %867 = vsyncadd (!%p739_p8), %s535_s29, 4294966784  ;;  %p30_p9 = scmp.ge.s32.totalorder %s961_s15, 9   ;;  %s1134_s10 = smov %s874_s11 }
 0x241   : > { %s1135_s11 = smov %s878_s2  ;;  %s1136_s2 = smov %s982_s22 }
 0x242   : > { %s1137_s12 = smov %s961_s15  ;;  %32 = sbr.rel (!%p30_p9) target bundleno = 38 (0x26), region = 78 }
 0x249   :  { %540 = vsyncpa [#allocation8], 1 }
 0x24a   :  { %542 = vsyncpa [#allocation8 + $0x1], 1 }

</bundles_post_ra>
